<compile_context>
chip_gen: v6e
topology: v6e:2x2x1
jax: 0.10.0
libtpu: 0.0.40
codegen_flags: <defaults>
</compile_context>

<pallas_src>
import functools

import jax
import jax.numpy as jnp
from jax.experimental import pallas as pl
from jax.experimental.pallas import tpu as pltpu

LANES = 128
MAX_TILE_ROWS = 4096                 # (4096, 128) f32 = 2 MiB / block / input
VMEM_LIMIT_BYTES = 32 * 1024 * 1024  # explicit: above v5e's 16 MiB scoped default


def _round_up(x, m):
    return (x + m - 1) // m * m


def _num_tensorcores():
    """2 on chips with two TensorCores per jax device (v7x, v4/v5p megacore), else 1."""
    try:
        dev = jax.devices()[0]
        if dev.platform != "tpu":
            return 1
        kind = (getattr(dev, "device_kind", "") or "").lower()
        # Single-TensorCore devices: v5e / v6e ("lite") -- avoid a pointless
        # serial 2-way split there.
        if "lite" in kind or "v5e" in kind or "v6" in kind:
            return 1
        # Two TensorCores per device: v7x, v4 / v5p megacore.
        if "v7" in kind or "7x" in kind or "v4" in kind or "v5p" in kind:
            return 2
        return 1
    except Exception:
        return 1


def _bce_kernel(x_ref, t_ref, acc_ref, *, tiles_per_core, total_tiles,
                last_rows, acc_rows, guard_phantom):
    c = pl.program_id(0)
    i = pl.program_id(1)
    g = c * tiles_per_core + i          # global tile index

    @pl.when(i == 0)
    def _init():
        acc_ref[...] = jnp.zeros_like(acc_ref)

    p = x_ref[...].astype(jnp.float32)
    t = t_ref[...].astype(jnp.float32)

    # PyTorch BCELoss clamps each log term at -100 (avoids -inf/NaN at p=0/1).
    log_p = jnp.maximum(jnp.log(p), -100.0)
    log_1mp = jnp.maximum(jnp.log(1.0 - p), -100.0)
    loss = -(t * log_p + (1.0 - t) * log_1mp)

    def _accumulate(vals):
        # (tile_rows,128) -> (tile_rows//acc_rows, acc_rows, 128) splits the
        # sublane axis at a multiple of 8 (layout-free).  Summing axis 0 gives
        # acc_rows/8 independent vreg add chains into the resident accumulator
        # instead of one long dependent chain.
        acc_ref[...] += vals.reshape(-1, acc_rows, LANES).sum(axis=0)

    if last_rows:
        # The last real tile is ragged: block rows >= last_rows are
        # out-of-bounds garbage (log of garbage may be NaN/Inf).  This MUST
        # stay a select (jnp.where) -- rewriting it as `loss * mask` would let
        # NaN/Inf from the garbage rows leak into the sum.
        @pl.when(g < total_tiles - 1)
        def _full():
            _accumulate(loss)

        @pl.when(g == total_tiles - 1)
        def _last():
            row_ids = jax.lax.broadcasted_iota(jnp.int32, loss.shape, 0)
            _accumulate(jnp.where(row_ids < last_rows, loss, 0.0))
    elif guard_phantom:
        # num_cores * tiles_per_core > total_tiles: the (single) padding grid
        # step maps (clamped) onto the last real tile; skip double-counting it.
        @pl.when(g < total_tiles)
        def _real():
            _accumulate(loss)
    else:
        _accumulate(loss)


def bce_loss(inputs, targets):
    """Mean binary cross-entropy; semantics of torch.nn.BCELoss() (mean reduction)."""
    assert inputs.shape == targets.shape
    n_valid = int(inputs.size)
    if n_valid == 0:
        # torch.nn.BCELoss returns NaN for the empty mean.
        return jnp.array(jnp.nan, dtype=jnp.float32)

    x = inputs.reshape(-1)   # free reshape; keep native dtype
    t = targets.reshape(-1)

    # Sublane alignment: 8 rows for 32-bit, 16 for 16-bit, 32 for 8-bit dtypes.
    itemsize = min(jnp.dtype(x.dtype).itemsize, jnp.dtype(t.dtype).itemsize)
    align_rows = max(8, 32 // itemsize)

    n = n_valid
    lane_pad = (-n) % LANES
    if lane_pad:
        # Rare fallback (element count not a multiple of 128): pad the tail so
        # the (rows, 128) view exists.  p=0, t=0 contributes exactly 0 loss
        # after the -100 log clamp, so the pad itself needs no masking.
        # TODO(synk): a fully copy-free path for N % 128 != 0 would need a
        # manual-DMA (memory_space=pl.ANY) 1-D tail gather.
        x = jnp.concatenate([x, jnp.zeros((lane_pad,), x.dtype)])
        t = jnp.concatenate([t, jnp.zeros((lane_pad,), t.dtype)])
        n += lane_pad

    rows = n // LANES
    x2 = x.reshape(rows, LANES)    # free: lane-dense (rows, 128) view
    t2 = t.reshape(rows, LANES)

    num_cores = _num_tensorcores()
    tile_rows = min(MAX_TILE_ROWS, _round_up(rows, align_rows))
    total_tiles = pl.cdiv(rows, tile_rows)
    tiles_per_core = pl.cdiv(total_tiles, num_cores)
    last_rows = rows % tile_rows          # 0 => last tile is full, no mask
    acc_rows = 64 if tile_rows % 64 == 0 else 8
    guard_phantom = num_cores * tiles_per_core > total_tiles

    kernel = functools.partial(
        _bce_kernel,
        tiles_per_core=tiles_per_core,
        total_tiles=total_tiles,
        last_rows=last_rows,
        acc_rows=acc_rows,
        guard_phantom=guard_phantom,
    )

    def in_map(c, i):
        # Clamp so the (at most one) padding grid step on the second core maps
        # to a valid block; its contribution is skipped inside the kernel.
        return (jnp.minimum(c * tiles_per_core + i, total_tiles - 1), 0)

    partials = pl.pallas_call(
        kernel,
        out_shape=jax.ShapeDtypeStruct((num_cores, acc_rows, LANES), jnp.float32),
        grid_spec=pltpu.PrefetchScalarGridSpec(
            num_scalar_prefetch=0,
            grid=(num_cores, tiles_per_core),
            in_specs=[
                pl.BlockSpec((tile_rows, LANES), in_map),
                pl.BlockSpec((tile_rows, LANES), in_map),
            ],
            out_specs=pl.BlockSpec((None, acc_rows, LANES), lambda c, i: (c, 0, 0)),
        ),
        compiler_params=pltpu.CompilerParams(
            # Leading axis shards tiles across the two TensorCores on
            # v7x / megacore chips; trailing axis streams tiles into the
            # resident accumulator.  (If xprof shows a single active TC on
            # v7x, switch the leading axis to pltpu.CORE_PARALLEL.)
            dimension_semantics=("parallel", "arbitrary"),
            vmem_limit_bytes=VMEM_LIMIT_BYTES,
        ),
    )(x2, t2)

    # Final cross-lane reduce + mean (compile-time-constant denominator).
    return jnp.sum(partials) / n_valid


def bce_loss_ref(inputs, targets):
    p = inputs.astype(jnp.float32)
    t = targets.astype(jnp.float32)
    log_p = jnp.maximum(jnp.log(p), -100.0)
    log_1mp = jnp.maximum(jnp.log(1.0 - p), -100.0)
    return jnp.mean(-(t * log_p + (1.0 - t) * log_1mp))


if __name__ == "__main__":
    key = jax.random.PRNGKey(0)
    k1, k2 = jax.random.split(key)
    # NCHW probabilities, small shapes: batch=2, channels=4, spatial=16x16
    inputs = jax.random.uniform(k1, (2, 4, 16, 16), jnp.float32,
                                minval=1e-4, maxval=1.0 - 1e-4)
    targets = (jax.random.uniform(k2, (2, 4, 16, 16)) > 0.5).astype(jnp.float32)

    loss = jax.block_until_ready(bce_loss(inputs, targets))
    ref = jax.block_until_ready(bce_loss_ref(inputs, targets))
    assert jnp.allclose(loss, ref, rtol=1e-5, atol=1e-5), (loss, ref)

    # Extra coverage: lane-aligned but ragged row count (zero-copy + row mask),
    # and a non-multiple-of-128 element count (tail-pad fallback).
    for shape in ((2, 3, 16, 16), (3, 5, 7, 11)):
        ka, kb = jax.random.split(jax.random.PRNGKey(1))
        xi = jax.random.uniform(ka, shape, jnp.float32,
                                minval=1e-4, maxval=1.0 - 1e-4)
        ti = (jax.random.uniform(kb, shape) > 0.5).astype(jnp.float32)
        out = jax.block_until_ready(bce_loss(xi, ti))
        refi = jax.block_until_ready(bce_loss_ref(xi, ti))
        assert jnp.allclose(out, refi, rtol=1e-5, atol=1e-5), (shape, out, refi)

    print("KERNEL_OK")
</pallas_src>

<mosaic_0001>
module attributes {stable_mosaic.version = 11 : i64} {
  func.func @_bce_kernel(%arg0: i32, %arg1: i32, %arg2: memref<16x128xf32, #tpu.memory_space<vmem>>, %arg3: memref<16x128xf32, #tpu.memory_space<vmem>>, %arg4: memref<1x8x128xf32, #tpu.memory_space<vmem>>) attributes {dimension_semantics = [#tpu.dimension_semantics<parallel>, #tpu.dimension_semantics<arbitrary>], iteration_bounds = array<i64: 1, 1>, scalar_prefetch = 0 : i64, scratch_operands = 0 : i64, tpu.core_type = #tpu.core_type<tc>, window_params = [{transform_indices = @transform_0, window_bounds = array<i64: 16, 128>}, {transform_indices = @transform_1, window_bounds = array<i64: 16, 128>}, {transform_indices = @transform_2, window_bounds = array<i64: 1, 8, 128>}]} {
    %c0_i32 = arith.constant 0 : i32
    %0 = arith.cmpi eq, %arg1, %c0_i32 : i32
    %1 = arith.extui %0 : i1 to i32
    %c0_i32_0 = arith.constant 0 : i32
    %2 = arith.cmpi ne, %1, %c0_i32_0 : i32
    scf.if %2 {
      %cst_15 = arith.constant 0.000000e+00 : f32
      %28 = vector.broadcast %cst_15 : f32 to vector<8x128xf32>
      %c0_16 = arith.constant 0 : index
      %c0_17 = arith.constant 0 : index
      %c0_18 = arith.constant 0 : index
      %29 = vector.load %arg4[%c0_16, %c0_17, %c0_18] : memref<1x8x128xf32, #tpu.memory_space<vmem>>, vector<1x8x128xf32>
      %30 = vector.shape_cast %29 : vector<1x8x128xf32> to vector<8x128xf32>
      %31 = vector.shape_cast %28 : vector<8x128xf32> to vector<1x8x128xf32>
      tpu.vector_store %arg4[%c0_16, %c0_17, %c0_18], %31 {strides = array<i32>} : memref<1x8x128xf32, #tpu.memory_space<vmem>>, vector<1x8x128xf32>,
    } else {
    }
    %c0 = arith.constant 0 : index
    %c0_1 = arith.constant 0 : index
    %3 = vector.load %arg2[%c0, %c0_1] : memref<16x128xf32, #tpu.memory_space<vmem>>, vector<16x128xf32>
    %c0_2 = arith.constant 0 : index
    %c0_3 = arith.constant 0 : index
    %4 = vector.load %arg3[%c0_2, %c0_3] : memref<16x128xf32, #tpu.memory_space<vmem>>, vector<16x128xf32>
    %5 = math.log %3 : vector<16x128xf32>
    %cst = arith.constant -1.000000e+02 : f32
    %6 = vector.broadcast %cst : f32 to vector<16x128xf32>
    %7 = arith.maximumf %5, %6 : vector<16x128xf32>
    %cst_4 = arith.constant 1.000000e+00 : f32
    %8 = vector.broadcast %cst_4 : f32 to vector<16x128xf32>
    %9 = arith.subf %8, %3 : vector<16x128xf32>
    %10 = math.log %9 : vector<16x128xf32>
    %cst_5 = arith.constant -1.000000e+02 : f32
    %11 = vector.broadcast %cst_5 : f32 to vector<16x128xf32>
    %12 = arith.maximumf %10, %11 : vector<16x128xf32>
    %13 = arith.mulf %4, %7 : vector<16x128xf32>
    %cst_6 = arith.constant 1.000000e+00 : f32
    %14 = vector.broadcast %cst_6 : f32 to vector<16x128xf32>
    %15 = arith.subf %14, %4 : vector<16x128xf32>
    %16 = arith.mulf %15, %12 : vector<16x128xf32>
    %17 = arith.addf %13, %16 : vector<16x128xf32>
    %cst_7 = arith.constant 0.000000e+00 : f32
    %18 = vector.broadcast %cst_7 : f32 to vector<16x128xf32>
    %19 = arith.subf %18, %17 : vector<16x128xf32>
    %c0_8 = arith.constant 0 : index
    %c0_9 = arith.constant 0 : index
    %c0_10 = arith.constant 0 : index
    %20 = vector.load %arg4[%c0_8, %c0_9, %c0_10] : memref<1x8x128xf32, #tpu.memory_space<vmem>>, vector<1x8x128xf32>
    %21 = vector.shape_cast %20 : vector<1x8x128xf32> to vector<8x128xf32>
    %22 = vector.shape_cast %19 : vector<16x128xf32> to vector<2x8x128xf32>
    %cst_11 = arith.constant dense<0.000000e+00> : vector<8x128xf32>
    %23 = vector.multi_reduction <add>, %22, %cst_11 [0] : vector<2x8x128xf32> to vector<8x128xf32>
    %24 = arith.addf %21, %23 : vector<8x128xf32>
    %c0_12 = arith.constant 0 : index
    %c0_13 = arith.constant 0 : index
    %c0_14 = arith.constant 0 : index
    %25 = vector.load %arg4[%c0_12, %c0_13, %c0_14] : memref<1x8x128xf32, #tpu.memory_space<vmem>>, vector<1x8x128xf32>
    %26 = vector.shape_cast %25 : vector<1x8x128xf32> to vector<8x128xf32>
    %27 = vector.shape_cast %24 : vector<8x128xf32> to vector<1x8x128xf32>
    tpu.vector_store %arg4[%c0_12, %c0_13, %c0_14], %27 {strides = array<i32>} : memref<1x8x128xf32, #tpu.memory_space<vmem>>, vector<1x8x128xf32>,
    return
  }
  func.func @transform_0(%arg0: i32, %arg1: i32) -> (i32, i32) {
    %c1_i32 = arith.constant 1 : i32
    %0 = arith.muli %arg0, %c1_i32 : i32
    %1 = arith.addi %0, %arg1 : i32
    %c0_i32 = arith.constant 0 : i32
    %2 = arith.minsi %1, %c0_i32 : i32
    %c0_i32_0 = arith.constant 0 : i32
    %c0_i32_1 = arith.constant 0 : i32
    return %2, %c0_i32_0 : i32, i32
  }
  func.func @transform_1(%arg0: i32, %arg1: i32) -> (i32, i32) {
    %c1_i32 = arith.constant 1 : i32
    %0 = arith.muli %arg0, %c1_i32 : i32
    %1 = arith.addi %0, %arg1 : i32
    %c0_i32 = arith.constant 0 : i32
    %2 = arith.minsi %1, %c0_i32 : i32
    %c0_i32_0 = arith.constant 0 : i32
    %c0_i32_1 = arith.constant 0 : i32
    return %2, %c0_i32_0 : i32, i32
  }
  func.func @transform_2(%arg0: i32, %arg1: i32) -> (i32, i32, i32) {
    %c0_i32 = arith.constant 0 : i32
    %c0_i32_0 = arith.constant 0 : i32
    %c0_i32_1 = arith.constant 0 : i32
    return %arg0, %c0_i32, %c0_i32_0 : i32, i32, i32
  }
}

</mosaic_0001>

<bundles_post_ra>
// kernel: tpu_custom_call.1
= control target key start
LH: loop header
LB: loop body
LE: loop exit
PB: predicated region body
PF: predicated region fallthrough
CT: control target
= control target key end

     0   :  { %7 = vsyncpa [#allocation3], 0  ;;  %s226_s0 = inlined_call_operand.hbm [shape: f32[16,128], index: 0, kind: input, shape index: {}]   ;;  %s227_s1 = inlined_call_operand.hbm [shape: f32[16,128], index: 1, kind: input, shape index: {}]   ;;  %s228_s2 = inlined_call_operand.hbm [shape: f32[1,8,128], index: 2, kind: output, shape index: {}]  }
   0x1   :  { %8 = vsyncpa [#allocation6], 0 }
   0x2   :  { %9 = vsyncpa [#allocation4], 0  ;;  %s197_s9 = smov [#allocation2]  }
   0x3   :  { %s21_s10 = sshll.u32 %s197_s9, 4  ;;  %s22_s10 = int_to_ptr.vmem [resolvable:$true] %s21_s10 }
   0x4   :  { %s139_s11 = scalar_lea.vmem %s22_s10, 256  ;;  %p144_p1 = scmp.lt.s32.totalorder %s22_s10, %s22_s10 }
   0x5   :  { %p140_p0 = scmp.ne.s32.totalorder %s22_s10, %s139_s11  ;;  %p145_p2 = scmp.lt.s32.totalorder %s139_s11, %s139_s11 }
   0x7   :  { %p146_p3 = por %p145_p2, %p144_p1 }
   0x9   :  { %p147_p4 = pnand %p146_p3, %p140_p0 }
   0xb   :  { %150 = shalt.err (!%p147_p4)
}
   0xc   :  { %s198_s12 = smov 128   ;;  %s199_s13 = smov 8  }
   0xd   :  { %27 = dma.hbm_to_vmem [thread:$0]  %s226_s0, 256, %s22_s10, [#allocation3], %s198_s12, %s198_s12, %s199_s13  }
   0xe   :  { %s200_s16 = smov [#allocation5]  }
   0xf   :  { %s39_s17 = sshll.u32 %s200_s16, 4  ;;  %s40_s17 = int_to_ptr.vmem [resolvable:$true] %s39_s17 }
  0x10   :  { %s159_s18 = scalar_lea.vmem %s40_s17, 256  ;;  %p164_p6 = scmp.lt.s32.totalorder %s40_s17, %s40_s17 }
  0x11   :  { %p160_p5 = scmp.ne.s32.totalorder %s40_s17, %s159_s18  ;;  %p165_p7 = scmp.lt.s32.totalorder %s159_s18, %s159_s18 }
  0x13   :  { %p166_p8 = por %p165_p7, %p164_p6 }
  0x15   :  { %p167_p9 = pnand %p166_p8, %p160_p5 }
  0x17   :  { %170 = shalt.err (!%p167_p9)
}
  0x18   :  { %45 = dma.hbm_to_vmem [thread:$0]  %s227_s1, 256, %s40_s17, [#allocation6], %s198_s12, %s198_s12, %s199_s13  }
  0x19   :  { %191 = dma.done.wait [#allocation3], 256  }
  0x1a   :  { %192 = vsyncadd [#allocation3], 4294967040 }
  0x1b   :  { %193 = dma.done.wait [#allocation6], 256  }
  0x1c   :  { %194 = vsyncadd [#allocation6], 4294967040  ;;  %v65_v0 = vld [vmem:[#allocation2] sm:$0xff]  ;;  %v66_v1 = vld [vmem:[#allocation2 + $0x8] sm:$0xff]  ;;  %s201_s0 = smov [#allocation7]  }
  0x1d   :  { %123 = vlog2.f32 %v65_v0  ;;  %v75_v2 = vsub.f32 1.0, %v65_v0  ;;  %v76_v3 = vsub.f32 1.0, %v66_v1  ;;  %v67_v5 = vld [vmem:[#allocation5] sm:$0xff]  ;;  %v68_v7 = vld [vmem:[#allocation5 + $0x8] sm:$0xff]  ;;  %s103_s1 = sshll.u32 %s201_s0, 4  ;;  %s104_s1 = int_to_ptr.vmem [resolvable:$true] %s103_s1 }
  0x1e   :  { %125 = vlog2.f32 %v66_v1  ;;  %v85_v14 = vsub.f32 1.0, %v67_v5  ;;  %v86_v17 = vsub.f32 1.0, %v68_v7  ;;  %s171_s21 = scalar_lea.vmem %s104_s1, 128  ;;  %p176_p11 = scmp.lt.s32.totalorder %s104_s1, %s104_s1 }
  0x1f   :  { %127 = vlog2.f32 %v75_v2  ;;  %p172_p10 = scmp.ne.s32.totalorder %s104_s1, %s171_s21  ;;  %p177_p12 = scmp.lt.s32.totalorder %s171_s21, %s171_s21 }
  0x20   :  { %129 = vlog2.f32 %v76_v3 }
  0x21   :  { %p178_p13 = por %p177_p12, %p176_p11 }
  0x23   :  { %p179_p0 = pnand %p178_p13, %p172_p10 }
  0x2a   :  { %v124_v4 = vpop.eup %123 }
  0x2b   :  { %v126_v6 = vpop.eup %125  ;;  %v70_v8 = vmul.f32 0.6931472, %v124_v4 }
  0x2c   :  { %v128_v9 = vpop.eup %127  ;;  %v72_v10 = vmul.f32 0.6931472, %v126_v6 }
  0x2d   :  { %v130_v11 = vpop.eup %129  ;;  %v73_v12 = vmax.f32 %v70_v8, -100.0  ;;  %v78_v13 = vmul.f32 0.6931472, %v128_v9 }
  0x2e   :  { %v74_v15 = vmax.f32 %v72_v10, -100.0  ;;  %v80_v16 = vmul.f32 0.6931472, %v130_v11 }
  0x2f   :  { %v81_v18 = vmax.f32 %v78_v13, -100.0  ;;  %v83_v19 = vmul.f32 %v73_v12, %v67_v5 }
  0x30   :  { %v82_v20 = vmax.f32 %v80_v16, -100.0  ;;  %v84_v21 = vmul.f32 %v74_v15, %v68_v7 }
  0x31   :  { %v87_v22 = vmul.f32 %v85_v14, %v81_v18 }
  0x32   :  { %v88_v23 = vmul.f32 %v86_v17, %v82_v20 }
  0x33   :  { %v89_v24 = vadd.f32 %v87_v22, %v83_v19 }
  0x34   :  { %v90_v25 = vadd.f32 %v88_v23, %v84_v21 }
  0x35   :  { %v91_v26 = vsub.f32 0.0, %v89_v24 }
  0x36   :  { %v92_v27 = vsub.f32 0.0, %v90_v25 }
  0x38   :  { %v94_v28 = vadd.f32 %v92_v27, %v91_v26 }
  0x3a   :  { %96 = vst [vmem:[#allocation7] sm:$0xff] %v94_v28 }
  0x3b   :  { %182 = shalt.err (!%p179_p0)
}
  0x3c   :  { %106 = dma.vmem_to_hbm [thread:$0]  %s104_s1, 128, %s228_s2, [#allocation4]  }
  0x3d   :  { %195 = dma.done.wait [#allocation4], 128  }
  0x3e   :  { %196 = vsyncadd [#allocation4], 4294967168 }
  0x3f   :  { %110 = vsyncpa [#allocation3], 1 }
  0x40   :  { %111 = vsyncpa [#allocation6], 1 }
  0x41   :  { %112 = vsyncpa [#allocation4], 1 }

</bundles_post_ra>
